<compile_context>
chip_gen: v7x
topology: tpu7x:2x2x1
jax: 0.10.0
libtpu: 0.0.40
codegen_flags: <defaults>
</compile_context>

<pallas_src>
import functools

import numpy as np

import jax
import jax.numpy as jnp
from jax import lax
from jax.experimental import pallas as pl
from jax.experimental.pallas import tpu as pltpu

_LANES = 128
_SUBLANES = 8


def _round_up(x, m):
    return ((x + m - 1) // m) * m


@functools.lru_cache(maxsize=None)
def _tpu_config():
    """Generation-aware budgets (v5e/v6e: 128 MiB VMEM, 1 TC; v7x: 64 MiB, 2 TCs)."""
    vmem_phys = 64 << 20  # conservative (v7x-like) default if the query fails
    try:
        info = pltpu.get_tpu_info()
        v = int(getattr(info, "vmem_capacity_bytes", 0))
        if v > 0:
            vmem_phys = v
    except Exception:
        pass
    if vmem_phys >= (100 << 20):  # v5e / v6e: plenty of VMEM, single TensorCore
        return {"x_block_bytes": 6 << 20, "vmem_cap": 96 << 20, "multi_tc": False}
    # v7x-like: 64 MiB per TensorCore, two TensorCores -> keep blocks modest,
    # never request the whole VMEM, and prefer >= 2 grid steps.
    return {"x_block_bytes": 2 << 20, "vmem_cap": 56 << 20, "multi_tc": True}


def _sublane_multiple(dtype):
    # Native sublane tile: 8 rows for 4-byte, 16 for 2-byte, 32 for 1-byte dtypes.
    return max(_SUBLANES, 32 // max(1, jnp.dtype(dtype).itemsize))


def _pick_tile_rows(n_rows, cap_rows, sub, prefer_split):
    """Sublane tile: multiple of `sub`, VMEM-budget capped; optional 2-way split."""
    cap = max(sub, (cap_rows // sub) * sub)
    full = _round_up(n_rows, sub)
    if full <= cap:
        if prefer_split and n_rows >= 2 * sub:
            return min(_round_up(pl.cdiv(n_rows, 2), sub), full)
        return full
    return cap


def _pick_tile_lanes(n_lanes, cap_lanes, prefer_split):
    """Lane tile: multiple of 128, VMEM-budget capped; optional 2-way split."""
    cap = max(_LANES, (cap_lanes // _LANES) * _LANES)
    full = _round_up(n_lanes, _LANES)
    if full <= cap:
        if prefer_split and n_lanes >= 2 * _LANES:
            return min(_round_up(pl.cdiv(n_lanes, 2), _LANES), full)
        return full
    return cap


def _vmem_limit_bytes(block_padded_elems, in_item, out_item, n_tmp, cfg):
    # in + out blocks double-buffered at native dtype + n_tmp f32 block temps.
    need = block_padded_elems * (2 * in_item + 2 * out_item + n_tmp * 4) + (8 << 20)
    return int(min(max(need, 24 << 20), cfg["vmem_cap"]))


def _cost(n_elems, n_groups, itemsize):
    # Memory-bound: ~2 passes over the data, one rsqrt per normalized group.
    return pl.CostEstimate(
        flops=int(8 * n_elems),
        transcendentals=int(n_groups),
        bytes_accessed=int(2 * n_elems * itemsize),
    )


# ----------------------------------------------------------------------------
# channels_last: layer norm over the last dimension.
# ----------------------------------------------------------------------------
def _ln_last_packed_kernel(x_ref, w_ref, b_ref, sel_ref, selt_ref, o_ref, *,
                           eps, c, split_input):
    """k independent C-vectors packed per 128-wide lane row (lane-dense).

    Group sums go through the otherwise-idle MXU with resident 0/1 selector
    matrices; a hi/lo bf16 split keeps ~f32 accuracy.  bf16 inputs are exact in
    bf16, so their sum(x) reduction skips the split entirely.
    """
    sel = sel_ref[...]      # (k*C, k)  bf16, resident
    sel_t = selt_ref[...]   # (k, k*C)  bf16, resident
    xb = x_ref[...]
    x = xb.astype(jnp.float32)            # (TM, k*C)
    inv_c = 1.0 / c

    if split_input:
        x_hi = x.astype(jnp.bfloat16)
        x_lo = (x - x_hi.astype(jnp.float32)).astype(jnp.bfloat16)
        s1 = (jnp.dot(x_hi, sel, preferred_element_type=jnp.float32)
              + jnp.dot(x_lo, sel, preferred_element_type=jnp.float32))
    else:
        # bf16 input: exact as-is -> single MXU push for sum(x).
        s1 = jnp.dot(xb, sel, preferred_element_type=jnp.float32)

    xx = x * x
    xx_hi = xx.astype(jnp.bfloat16)
    xx_lo = (xx - xx_hi.astype(jnp.float32)).astype(jnp.bfloat16)
    s2 = (jnp.dot(xx_hi, sel, preferred_element_type=jnp.float32)
          + jnp.dot(xx_lo, sel, preferred_element_type=jnp.float32))

    mu = s1 * inv_c                                    # (TM, k)
    var = jnp.maximum(s2 * inv_c - mu * mu, 0.0)       # biased; clamp cancellation
    inv = lax.rsqrt(var + eps)                         # EUP

    def bcast(v):                                      # (TM, k) -> (TM, k*C), ~f32-exact
        v_hi = v.astype(jnp.bfloat16)
        v_lo = (v - v_hi.astype(jnp.float32)).astype(jnp.bfloat16)
        return (jnp.dot(v_hi, sel_t, preferred_element_type=jnp.float32)
                + jnp.dot(v_lo, sel_t, preferred_element_type=jnp.float32))

    mu_b = bcast(mu)
    inv_b = bcast(inv)

    w = w_ref[...].astype(jnp.float32)                 # (1, k*C) resident
    b = b_ref[...].astype(jnp.float32)
    scale = inv_b * w
    o_ref[...] = (x * scale + (b - mu_b * scale)).astype(o_ref.dtype)


def _ln_last_kernel(x_ref, w_ref, b_ref, o_ref, *, eps):
    """Plain path (C >= 128 or C does not divide 128): reduce along lanes."""
    # NOTE: for C < 128 that doesn't divide 128 (e.g. 48) the store is not
    # lane-dense; channel-padding to a divisor of 128 would cost an extra HBM
    # pass, so the plain path is kept instead.
    x = x_ref[...].astype(jnp.float32)                 # (TM, C)
    c = x.shape[-1]
    inv_c = 1.0 / c
    s1 = jnp.sum(x, axis=-1, keepdims=True)
    s2 = jnp.sum(x * x, axis=-1, keepdims=True)
    mu = s1 * inv_c
    var = jnp.maximum(s2 * inv_c - mu * mu, 0.0)       # biased variance
    inv = lax.rsqrt(var + eps)
    w = w_ref[...].astype(jnp.float32)                 # (1, C)
    b = b_ref[...].astype(jnp.float32)
    scale = inv * w
    o_ref[...] = (x * scale + (b - mu * scale)).astype(o_ref.dtype)


def layernorm_channels_last(x, weight, bias, eps=1e-6):
    """x: (..., C); weight, bias: (C,). Normalizes over the last dim."""
    orig_shape = x.shape
    C = int(orig_shape[-1])
    x2 = x.reshape(-1, C)                              # layout-preserving
    M = x2.shape[0]

    cfg = _tpu_config()
    sub = _sublane_multiple(x.dtype)
    itemsize = jnp.dtype(x.dtype).itemsize

    # Lane packing: fold k = 128 // C rows into one lane row when C | 128 and
    # the row count allows a copy-free reshape.
    k = _LANES // C if (C < _LANES and _LANES % C == 0) else 1
    packed = (k > 1) and (M % k == 0)

    if packed:
        rows, cw = M // k, k * C
        xk = x2.reshape(rows, cw)                      # layout-preserving
        tm = _pick_tile_rows(rows, cfg["x_block_bytes"] // (cw * 4), sub,
                             prefer_split=cfg["multi_tc"])
        grid = (pl.cdiv(rows, tm),)

        w_in = jnp.tile(weight.reshape(1, C), (1, k))  # (1, k*C)
        b_in = jnp.tile(bias.reshape(1, C), (1, k))
        # Group selectors built once on the host (resident VMEM operands).
        col = np.arange(cw, dtype=np.int32) // C
        sel_np = (col[:, None] == np.arange(k, dtype=np.int32)[None, :])
        sel = jnp.asarray(sel_np.astype(np.float32), dtype=jnp.bfloat16)     # (cw, k)
        sel_t = jnp.asarray(sel_np.T.astype(np.float32), dtype=jnp.bfloat16)  # (k, cw)

        kernel = functools.partial(_ln_last_packed_kernel, eps=eps, c=C,
                                   split_input=(x.dtype != jnp.bfloat16))
        out = pl.pallas_call(
            kernel,
            out_shape=jax.ShapeDtypeStruct((rows, cw), x.dtype),
            grid_spec=pltpu.PrefetchScalarGridSpec(
                num_scalar_prefetch=0,
                grid=grid,
                in_specs=[
                    pl.BlockSpec((tm, cw), lambda i: (i, 0)),
                    pl.BlockSpec((1, cw), lambda i: (0, 0)),   # weight, resident
                    pl.BlockSpec((1, cw), lambda i: (0, 0)),   # bias, resident
                    pl.BlockSpec((cw, k), lambda i: (0, 0)),   # selector, resident
                    pl.BlockSpec((k, cw), lambda i: (0, 0)),   # selector^T, resident
                ],
                out_specs=pl.BlockSpec((tm, cw), lambda i: (i, 0)),
            ),
            compiler_params=pltpu.CompilerParams(
                dimension_semantics=("parallel",),
                vmem_limit_bytes=_vmem_limit_bytes(tm * cw, itemsize, itemsize,
                                                   8, cfg),
            ),
            cost_estimate=_cost(M * C, M, itemsize),
        )(xk, w_in, b_in, sel, sel_t)
        return out.reshape(orig_shape)

    # Plain path: block over rows; the row remainder is a partial edge block.
    c_lanes = _round_up(C, _LANES)
    tm = _pick_tile_rows(M, cfg["x_block_bytes"] // (c_lanes * 4), sub,
                         prefer_split=cfg["multi_tc"])
    grid = (pl.cdiv(M, tm),)
    w_in = weight.reshape(1, C)
    b_in = bias.reshape(1, C)

    out = pl.pallas_call(
        functools.partial(_ln_last_kernel, eps=eps),
        out_shape=jax.ShapeDtypeStruct((M, C), x.dtype),
        grid_spec=pltpu.PrefetchScalarGridSpec(
            num_scalar_prefetch=0,
            grid=grid,
            in_specs=[
                pl.BlockSpec((tm, C), lambda i: (i, 0)),
                pl.BlockSpec((1, C), lambda i: (0, 0)),
                pl.BlockSpec((1, C), lambda i: (0, 0)),
            ],
            out_specs=pl.BlockSpec((tm, C), lambda i: (i, 0)),
        ),
        compiler_params=pltpu.CompilerParams(
            dimension_semantics=("parallel",),
            vmem_limit_bytes=_vmem_limit_bytes(tm * c_lanes, itemsize, itemsize,
                                               6, cfg),
        ),
        cost_estimate=_cost(M * C, M, itemsize),
    )(x2, w_in, b_in)
    return out.reshape(orig_shape)


# ----------------------------------------------------------------------------
# channels_first: layer norm over the channel dimension of (N, C, *spatial).
# ----------------------------------------------------------------------------
def _ln_first_kernel(x_ref, w_ref, b_ref, o_ref, *, eps):
    x = x_ref[...].astype(jnp.float32)                 # (C, TL): C sublanes, TL lanes
    c = x.shape[0]
    inv_c = 1.0 / c
    s1 = jnp.sum(x, axis=0, keepdims=True)             # (1, TL) cross-sublane reduce
    s2 = jnp.sum(x * x, axis=0, keepdims=True)
    mu = s1 * inv_c
    var = jnp.maximum(s2 * inv_c - mu * mu, 0.0)       # biased; clamp cancellation
    inv = lax.rsqrt(var + eps)
    w = w_ref[...].astype(jnp.float32)                 # (C, 1) resident
    b = b_ref[...].astype(jnp.float32)
    scale = inv * w                                    # (C, TL)
    o_ref[...] = (x * scale + (b - mu * scale)).astype(o_ref.dtype)


def layernorm_channels_first(x, weight, bias, eps=1e-6):
    """x: (N, C, *spatial); weight, bias: (C,). Normalizes over dim 1."""
    orig_shape = x.shape
    N, C = int(orig_shape[0]), int(orig_shape[1])
    L = 1
    for d in orig_shape[2:]:
        L *= int(d)
    x3 = x.reshape(N, C, L)                            # layout-preserving

    cfg = _tpu_config()
    itemsize = jnp.dtype(x.dtype).itemsize
    c_pad = _round_up(C, _sublane_multiple(x.dtype))   # sublane-padded footprint

    tl = _pick_tile_lanes(L, cfg["x_block_bytes"] // (c_pad * 4),
                          prefer_split=(cfg["multi_tc"] and N < 2))
    grid = (N, pl.cdiv(L, tl))

    w_in = weight.reshape(1, C, 1)
    b_in = bias.reshape(1, C, 1)

    out = pl.pallas_call(
        functools.partial(_ln_first_kernel, eps=eps),
        out_shape=jax.ShapeDtypeStruct((N, C, L), x.dtype),
        grid_spec=pltpu.PrefetchScalarGridSpec(
            num_scalar_prefetch=0,
            grid=grid,
            in_specs=[
                pl.BlockSpec((None, C, tl), lambda n, l: (n, 0, l)),
                pl.BlockSpec((None, C, 1), lambda n, l: (0, 0, 0)),   # weight
                pl.BlockSpec((None, C, 1), lambda n, l: (0, 0, 0)),   # bias
            ],
            out_specs=pl.BlockSpec((None, C, tl), lambda n, l: (n, 0, l)),
        ),
        compiler_params=pltpu.CompilerParams(
            dimension_semantics=("parallel", "parallel"),
            vmem_limit_bytes=_vmem_limit_bytes(c_pad * tl, itemsize, itemsize,
                                               6, cfg),
        ),
        cost_estimate=_cost(N * C * L, N * L, itemsize),
    )(x3, w_in, b_in)
    return out.reshape(orig_shape)


# ----------------------------------------------------------------------------
# Pure-JAX references (for sanity checking).
# ----------------------------------------------------------------------------
def _ref_channels_last(x, w, b, eps):
    mu = jnp.mean(x, axis=-1, keepdims=True)
    var = jnp.mean((x - mu) ** 2, axis=-1, keepdims=True)
    return (x - mu) / jnp.sqrt(var + eps) * w + b


def _ref_channels_first(x, w, b, eps):
    u = jnp.mean(x, axis=1, keepdims=True)
    s = jnp.mean((x - u) ** 2, axis=1, keepdims=True)
    y = (x - u) / jnp.sqrt(s + eps)
    return w[None, :, None, None, None] * y + b[None, :, None, None, None]


if __name__ == "__main__":
    key = jax.random.PRNGKey(0)
    k1, k2, k3, k4, k5, k6 = jax.random.split(key, 6)
    eps = 1e-6

    # ---- channels_last: x (2, 8, 8, 32) — packed (lane-dense) f32 path -----
    C_last = 32
    x_cl = jax.random.normal(k1, (2, 8, 8, C_last), dtype=jnp.float32)
    w_cl = jnp.ones((C_last,), jnp.float32) + 0.1 * jax.random.normal(
        k3, (C_last,), jnp.float32)
    b_cl = 0.1 * jax.random.normal(k4, (C_last,), jnp.float32)

    y_cl = jax.block_until_ready(layernorm_channels_last(x_cl, w_cl, b_cl, eps))
    ref_cl = _ref_channels_last(x_cl, w_cl, b_cl, eps)
    assert y_cl.shape == x_cl.shape
    assert jnp.allclose(y_cl, ref_cl, atol=1e-4, rtol=1e-4), float(
        jnp.max(jnp.abs(y_cl - ref_cl)))

    # ---- channels_last: bf16 input — exact-sum specialization --------------
    x_bf = x_cl.astype(jnp.bfloat16)
    y_bf = jax.block_until_ready(layernorm_channels_last(x_bf, w_cl, b_cl, eps))
    ref_bf = _ref_channels_last(x_bf.astype(jnp.float32), w_cl, b_cl, eps)
    assert y_bf.dtype == jnp.bfloat16
    assert jnp.allclose(y_bf.astype(jnp.float32), ref_bf, atol=5e-2, rtol=5e-2), \
        float(jnp.max(jnp.abs(y_bf.astype(jnp.float32) - ref_bf)))

    # ---- channels_last: awkward C / row count — plain path, partial block --
    C_odd = 48
    x_cl2 = jax.random.normal(k5, (3, 5, C_odd), dtype=jnp.float32)
    w_cl2 = jnp.ones((C_odd,), jnp.float32) + 0.1 * jax.random.normal(
        k6, (C_odd,), jnp.float32)
    b_cl2 = 0.1 * jax.random.normal(k3, (C_odd,), jnp.float32)
    y_cl2 = jax.block_until_ready(
        layernorm_channels_last(x_cl2, w_cl2, b_cl2, eps))
    ref_cl2 = _ref_channels_last(x_cl2, w_cl2, b_cl2, eps)
    assert jnp.allclose(y_cl2, ref_cl2, atol=1e-4, rtol=1e-4), float(
        jnp.max(jnp.abs(y_cl2 - ref_cl2)))

    # ---- channels_first: x (2, 4, 4, 8, 8) ----------------------------------
    C_first = 4
    x_cf = jax.random.normal(k2, (2, C_first, 4, 8, 8), dtype=jnp.float32)
    w_cf = jnp.ones((C_first,), jnp.float32) + 0.1 * jax.random.normal(
        k3, (C_first,), jnp.float32)
    b_cf = 0.1 * jax.random.normal(k4, (C_first,), jnp.float32)

    y_cf = jax.block_until_ready(
        layernorm_channels_first(x_cf, w_cf, b_cf, eps))
    ref_cf = _ref_channels_first(x_cf, w_cf, b_cf, eps)
    assert y_cf.shape == x_cf.shape
    assert jnp.allclose(y_cf, ref_cf, atol=1e-4, rtol=1e-4), float(
        jnp.max(jnp.abs(y_cf - ref_cf)))

    # ---- channels_first with L not a multiple of 128 (partial lane block) --
    x_cf2 = jax.random.normal(k5, (1, C_first, 3, 5, 7), dtype=jnp.float32)
    y_cf2 = jax.block_until_ready(
        layernorm_channels_first(x_cf2, w_cf, b_cf, eps))
    ref_cf2 = _ref_channels_first(x_cf2, w_cf, b_cf, eps)
    assert jnp.allclose(y_cf2, ref_cf2, atol=1e-4, rtol=1e-4), float(
        jnp.max(jnp.abs(y_cf2 - ref_cf2)))

    print("KERNEL_OK")
</pallas_src>

<mosaic_0001>
module attributes {stable_mosaic.version = 11 : i64} {
  func.func @_ln_last_packed_kernel(%arg0: i32, %arg1: memref<16x128xf32, #tpu.memory_space<vmem>>, %arg2: memref<1x128xf32, #tpu.memory_space<vmem>>, %arg3: memref<1x128xf32, #tpu.memory_space<vmem>>, %arg4: memref<128x4xbf16, #tpu.memory_space<vmem>>, %arg5: memref<4x128xbf16, #tpu.memory_space<vmem>>, %arg6: memref<16x128xf32, #tpu.memory_space<vmem>>) attributes {dimension_semantics = [#tpu.dimension_semantics<parallel>], iteration_bounds = array<i64: 2>, scalar_prefetch = 0 : i64, scratch_operands = 0 : i64, tpu.core_type = #tpu.core_type<tc>, window_params = [{transform_indices = @transform_0, window_bounds = array<i64: 16, 128>}, {pipeline_mode = #tpu.pipeline_mode<synchronous>, transform_indices = @transform_1, window_bounds = array<i64: 1, 128>}, {pipeline_mode = #tpu.pipeline_mode<synchronous>, transform_indices = @transform_2, window_bounds = array<i64: 1, 128>}, {pipeline_mode = #tpu.pipeline_mode<synchronous>, transform_indices = @transform_3, window_bounds = array<i64: 128, 4>}, {pipeline_mode = #tpu.pipeline_mode<synchronous>, transform_indices = @transform_4, window_bounds = array<i64: 4, 128>}, {transform_indices = @transform_5, window_bounds = array<i64: 16, 128>}]} {
    %c0 = arith.constant 0 : index
    %c0_0 = arith.constant 0 : index
    %0 = vector.load %arg4[%c0, %c0_0] : memref<128x4xbf16, #tpu.memory_space<vmem>>, vector<128x4xbf16>
    %c0_1 = arith.constant 0 : index
    %c0_2 = arith.constant 0 : index
    %1 = vector.load %arg5[%c0_1, %c0_2] : memref<4x128xbf16, #tpu.memory_space<vmem>>, vector<4x128xbf16>
    %c0_3 = arith.constant 0 : index
    %c0_4 = arith.constant 0 : index
    %2 = vector.load %arg1[%c0_3, %c0_4] : memref<16x128xf32, #tpu.memory_space<vmem>>, vector<16x128xf32>
    %3 = arith.truncf %2 : vector<16x128xf32> to vector<16x128xbf16>
    %4 = arith.extf %3 : vector<16x128xbf16> to vector<16x128xf32>
    %5 = arith.subf %2, %4 : vector<16x128xf32>
    %6 = arith.truncf %5 : vector<16x128xf32> to vector<16x128xbf16>
    %cst = arith.constant dense<0.000000e+00> : vector<16x4xf32>
    %7 = tpu.matmul %3, %0, %cst {dimension_numbers = #tpu.dot_dimension_numbers<[1], [0], [0], [1], [0, 0, 1, 1], [], []>} : vector<16x128xbf16>, vector<128x4xbf16>, vector<16x4xf32> -> vector<16x4xf32>
    %cst_5 = arith.constant dense<0.000000e+00> : vector<16x4xf32>
    %8 = tpu.matmul %6, %0, %cst_5 {dimension_numbers = #tpu.dot_dimension_numbers<[1], [0], [0], [1], [0, 0, 1, 1], [], []>} : vector<16x128xbf16>, vector<128x4xbf16>, vector<16x4xf32> -> vector<16x4xf32>
    %9 = arith.addf %7, %8 : vector<16x4xf32>
    %10 = arith.mulf %2, %2 : vector<16x128xf32>
    %11 = arith.truncf %10 : vector<16x128xf32> to vector<16x128xbf16>
    %12 = arith.extf %11 : vector<16x128xbf16> to vector<16x128xf32>
    %13 = arith.subf %10, %12 : vector<16x128xf32>
    %14 = arith.truncf %13 : vector<16x128xf32> to vector<16x128xbf16>
    %cst_6 = arith.constant dense<0.000000e+00> : vector<16x4xf32>
    %15 = tpu.matmul %11, %0, %cst_6 {dimension_numbers = #tpu.dot_dimension_numbers<[1], [0], [0], [1], [0, 0, 1, 1], [], []>} : vector<16x128xbf16>, vector<128x4xbf16>, vector<16x4xf32> -> vector<16x4xf32>
    %cst_7 = arith.constant dense<0.000000e+00> : vector<16x4xf32>
    %16 = tpu.matmul %14, %0, %cst_7 {dimension_numbers = #tpu.dot_dimension_numbers<[1], [0], [0], [1], [0, 0, 1, 1], [], []>} : vector<16x128xbf16>, vector<128x4xbf16>, vector<16x4xf32> -> vector<16x4xf32>
    %17 = arith.addf %15, %16 : vector<16x4xf32>
    %cst_8 = arith.constant 3.125000e-02 : f32
    %18 = vector.broadcast %cst_8 : f32 to vector<16x4xf32>
    %19 = arith.mulf %9, %18 : vector<16x4xf32>
    %cst_9 = arith.constant 3.125000e-02 : f32
    %20 = vector.broadcast %cst_9 : f32 to vector<16x4xf32>
    %21 = arith.mulf %17, %20 : vector<16x4xf32>
    %22 = arith.mulf %19, %19 : vector<16x4xf32>
    %23 = arith.subf %21, %22 : vector<16x4xf32>
    %cst_10 = arith.constant 0.000000e+00 : f32
    %24 = vector.broadcast %cst_10 : f32 to vector<16x4xf32>
    %25 = arith.maximumf %23, %24 : vector<16x4xf32>
    %cst_11 = arith.constant 9.99999997E-7 : f32
    %26 = vector.broadcast %cst_11 : f32 to vector<16x4xf32>
    %27 = arith.addf %25, %26 : vector<16x4xf32>
    %28 = math.rsqrt %27 : vector<16x4xf32>
    %29 = arith.truncf %19 : vector<16x4xf32> to vector<16x4xbf16>
    %30 = arith.extf %29 : vector<16x4xbf16> to vector<16x4xf32>
    %31 = arith.subf %19, %30 : vector<16x4xf32>
    %32 = arith.truncf %31 : vector<16x4xf32> to vector<16x4xbf16>
    %cst_12 = arith.constant dense<0.000000e+00> : vector<16x128xf32>
    %33 = tpu.matmul %29, %1, %cst_12 {dimension_numbers = #tpu.dot_dimension_numbers<[1], [0], [0], [1], [0, 0, 1, 1], [], []>} : vector<16x4xbf16>, vector<4x128xbf16>, vector<16x128xf32> -> vector<16x128xf32>
    %cst_13 = arith.constant dense<0.000000e+00> : vector<16x128xf32>
    %34 = tpu.matmul %32, %1, %cst_13 {dimension_numbers = #tpu.dot_dimension_numbers<[1], [0], [0], [1], [0, 0, 1, 1], [], []>} : vector<16x4xbf16>, vector<4x128xbf16>, vector<16x128xf32> -> vector<16x128xf32>
    %35 = arith.addf %33, %34 : vector<16x128xf32>
    %36 = arith.truncf %28 : vector<16x4xf32> to vector<16x4xbf16>
    %37 = arith.extf %36 : vector<16x4xbf16> to vector<16x4xf32>
    %38 = arith.subf %28, %37 : vector<16x4xf32>
    %39 = arith.truncf %38 : vector<16x4xf32> to vector<16x4xbf16>
    %cst_14 = arith.constant dense<0.000000e+00> : vector<16x128xf32>
    %40 = tpu.matmul %36, %1, %cst_14 {dimension_numbers = #tpu.dot_dimension_numbers<[1], [0], [0], [1], [0, 0, 1, 1], [], []>} : vector<16x4xbf16>, vector<4x128xbf16>, vector<16x128xf32> -> vector<16x128xf32>
    %cst_15 = arith.constant dense<0.000000e+00> : vector<16x128xf32>
    %41 = tpu.matmul %39, %1, %cst_15 {dimension_numbers = #tpu.dot_dimension_numbers<[1], [0], [0], [1], [0, 0, 1, 1], [], []>} : vector<16x4xbf16>, vector<4x128xbf16>, vector<16x128xf32> -> vector<16x128xf32>
    %42 = arith.addf %40, %41 : vector<16x128xf32>
    %c0_16 = arith.constant 0 : index
    %c0_17 = arith.constant 0 : index
    %43 = vector.load %arg2[%c0_16, %c0_17] : memref<1x128xf32, #tpu.memory_space<vmem>>, vector<1x128xf32>
    %c0_18 = arith.constant 0 : index
    %c0_19 = arith.constant 0 : index
    %44 = vector.load %arg3[%c0_18, %c0_19] : memref<1x128xf32, #tpu.memory_space<vmem>>, vector<1x128xf32>
    %45 = vector.broadcast %43 : vector<1x128xf32> to vector<16x128xf32>
    %46 = arith.mulf %42, %45 : vector<16x128xf32>
    %47 = arith.mulf %2, %46 : vector<16x128xf32>
    %48 = arith.mulf %35, %46 : vector<16x128xf32>
    %49 = vector.broadcast %44 : vector<1x128xf32> to vector<16x128xf32>
    %50 = arith.subf %49, %48 : vector<16x128xf32>
    %51 = arith.addf %47, %50 : vector<16x128xf32>
    %c0_20 = arith.constant 0 : index
    %c0_21 = arith.constant 0 : index
    %52 = vector.load %arg6[%c0_20, %c0_21] : memref<16x128xf32, #tpu.memory_space<vmem>>, vector<16x128xf32>
    tpu.vector_store %arg6[%c0_20, %c0_21], %51 {strides = array<i32>} : memref<16x128xf32, #tpu.memory_space<vmem>>, vector<16x128xf32>,
    return
  }
  func.func @transform_0(%arg0: i32) -> (i32, i32) {
    %c0_i32 = arith.constant 0 : i32
    %c0_i32_0 = arith.constant 0 : i32
    return %arg0, %c0_i32 : i32, i32
  }
  func.func @transform_1(%arg0: i32) -> (i32, i32) {
    %c0_i32 = arith.constant 0 : i32
    %c0_i32_0 = arith.constant 0 : i32
    %c0_i32_1 = arith.constant 0 : i32
    return %c0_i32, %c0_i32_0 : i32, i32
  }
  func.func @transform_2(%arg0: i32) -> (i32, i32) {
    %c0_i32 = arith.constant 0 : i32
    %c0_i32_0 = arith.constant 0 : i32
    %c0_i32_1 = arith.constant 0 : i32
    return %c0_i32, %c0_i32_0 : i32, i32
  }
  func.func @transform_3(%arg0: i32) -> (i32, i32) {
    %c0_i32 = arith.constant 0 : i32
    %c0_i32_0 = arith.constant 0 : i32
    %c0_i32_1 = arith.constant 0 : i32
    return %c0_i32, %c0_i32_0 : i32, i32
  }
  func.func @transform_4(%arg0: i32) -> (i32, i32) {
    %c0_i32 = arith.constant 0 : i32
    %c0_i32_0 = arith.constant 0 : i32
    %c0_i32_1 = arith.constant 0 : i32
    return %c0_i32, %c0_i32_0 : i32, i32
  }
  func.func @transform_5(%arg0: i32) -> (i32, i32) {
    %c0_i32 = arith.constant 0 : i32
    %c0_i32_0 = arith.constant 0 : i32
    return %arg0, %c0_i32 : i32, i32
  }
}

</mosaic_0001>

<bundles_post_ra>
// kernel: tpu_custom_call.1
= control target key start
LH: loop header
LB: loop body
LE: loop exit
PB: predicated region body
PF: predicated region fallthrough
CT: control target
= control target key end

     0   :  { %10 = vsyncpa [#allocation3], 0  ;;  %s1353_s0 = inlined_call_operand.vmem [shape: f32[32,128], index: 0, kind: input, shape index: {}]   ;;  %s1354_s1 = inlined_call_operand.vmem [shape: f32[1,128], index: 1, kind: input, shape index: {}]   ;;  %s1355_s2 = inlined_call_operand.vmem [shape: f32[1,128], index: 2, kind: input, shape index: {}]   ;;  %s1356_s3 = inlined_call_operand.vmem [shape: bf16[128,4], index: 3, kind: input, shape index: {}]   ;;  %s1357_s4 = inlined_call_operand.vmem [shape: bf16[4,128], index: 4, kind: input, shape index: {}]   ;;  %s1358_s5 = inlined_call_operand.hbm [shape: f32[32,128], index: 5, kind: output, shape index: {}]  }
   0x1   :  { %12 = vsyncpa [#allocation3 + $0x1], 0  ;;  %s1126_s18 = smov 0   ;;  %s1128_s19 = smov 0  }
   0x2   :  { %s1130_s20 = smov 0   ;;  %s1132_s21 = smov 0  }
   0x3 LB: > { %s1147_s22 = sadd.s32 4294967295, %s1089_s21   ;;  %s781_s23 = sadd.s32 4294967294, %s1089_s21   ;;  %s1089_s21 = sphi %s1132_s21, %s1364_s21   ;;  %s1085_s20 = sphi %s1130_s20, %s1363_s20   ;;  %s1081_s19 = sphi %s1128_s19, %s1362_s19   ;;  %s1077_s18 = sphi %s1126_s18, %s1361_s18  }
   0x4   : > { %s1151_s24 = sadd.s32 1, %s1089_s21   ;;  %s135_s25 = sadd.s32 1, %s1085_s20 }
   0x5   : > { %s132_s26 = ssub.s32 %s1089_s21, %s1151_s24  ;;  %p145_p0 = scmp.ne.s32.totalorder %s1085_s20, %s1081_s19 }
   0x6   : > { %p133_p1 = scmp.eq.s32.totalorder %s132_s26, 0  ;;  %p146_p2 = scmp.eq.s32.totalorder %s1147_s22, 1 }
   0x7   : > { %p151_p3 = scmp.ne.s32.totalorder %s1081_s19, %s1077_s18  ;;  %p152_p4 = scmp.eq.s32.totalorder %s781_s23, 1 }
   0x8   : > { %s1162_s27 = scalar_select %p133_p1, %s1085_s20, %s135_s25  }
   0x9   : > { %p1164_p5 = por %p146_p2, %p145_p0  ;;  %p1168_p6 = por %p152_p4, %p151_p3 }
   0xa   : > { %p784_p7 = scmp.ge.s32.totalorder %s1089_s21, 1  ;;  %p191_p8 = scmp.lt.s32.totalorder %s1089_s21, 3 }
   0xc   : > { %p192_p9 = pnand %p784_p7, %p191_p8 }
   0xd   : > { %v1177_v0 = vld [vmem:[%s1356_s3] sm:$0xff] (!%p192_p9)   ;;  %v1091_v1 = vmov (!%p192_p9), 0.0   ;;  %v1186_v2 = vld [vmem:[%s1356_s3 + $0x8] sm:$0xff] (!%p192_p9)   ;;  %s786_s9 = sshll.u32 (!%p192_p9), %s1147_s22, 1  ;;  %vm1092_vm0 = vmmov (!%p192_p9), 0   ;;  %v1017_v3 = vld [vmem:[%s1356_s3 + $0x10] sm:$0xff] (!%p192_p9)  }
   0xe   : > { %195 = sbr.rel (%p192_p9) target bundleno = 570 (0x23a), region = 40  ;;  %852 = vmatprep.subr.bf16.mxu0 (!%p192_p9), %v1091_v1  ;;  %892 = vmatprep.subr.bf16.mxu1 (!%p192_p9), %v1091_v1  ;;  %p220_p10 = scmp.lt.s32.totalorder (!%p192_p9), %s786_s9, 3  ;;  %v1018_v4 = vld [vmem:[%s1356_s3 + $0x18] sm:$0xff] (!%p192_p9)   ;;  %v1019_v9 = vld [vmem:[%s1356_s3 + $0x20] sm:$0xff] (!%p192_p9)   ;;  %v1020_v12 = vld [vmem:[%s1356_s3 + $0x28] sm:$0xff] (!%p192_p9)   ;;  %vm496_vm1 = vcmask (!%p192_p9), 1041408  }
   0xf   : > { %853 = vmatpush3.bf16.msra.mxu0 (!%p192_p9), %v1177_v0  ;;  %893 = vmatpush3.bf16.msra.mxu1 (!%p192_p9), %v1177_v0  ;;  %v1021_v17 = vld [vmem:[%s1356_s3 + $0x30] sm:$0xff] (!%p192_p9)   ;;  %v1022_v22 = vld [vmem:[%s1356_s3 + $0x38] sm:$0xff] (!%p192_p9)   ;;  %v243_v25 = vld [vmem:[%s1357_s4] sm:$0x3] (!%p192_p9)  ;;  %vm492_vm2 = vcmask (!%p192_p9), 31744   ;;  %s807_s26 = sshll.u32 (!%p192_p9), %s1147_s22, 8 }
  0x10   : > { %854 = vmatprep.subr.bf16.mxu0 (!%p192_p9), %v1091_v1  ;;  %894 = vmatprep.subr.bf16.mxu1 (!%p192_p9), %v1091_v1  ;;  %v498_v26 = vsel (!%p192_p9), %vm496_vm1, %v243_v25, 0  ;;  %s1310_s7 = scalar_lea.hbm (!%p192_p9), %s1358_s5, %s807_s26 }
  0x11   : > { %868 = vmatprep.mubr.msk.bf16.mxu0 (!%p192_p9), %vm1092_vm0, %v1091_v1  ;;  %908 = vmatprep.mubr.msk.bf16.mxu1 (!%p192_p9), %vm1092_vm0, %v1091_v1 }
  0x13   : > { %855 = vmatpush3.bf16.msra.mxu0 (!%p192_p9), %v1186_v2  ;;  %895 = vmatpush3.bf16.msra.mxu1 (!%p192_p9), %v1186_v2 }
  0x14   : > { %856 = vmatprep.subr.bf16.mxu0 (!%p192_p9), %v1091_v1  ;;  %896 = vmatprep.subr.bf16.mxu1 (!%p192_p9), %v1091_v1 }
  0x15   : > { %s1366_s9 = smov (!%p220_p10, %s786_s9), 3 }
  0x16   : > { %s787_s12 = sshll.u32 %s1366_s9, 3  ;;  %s1093_s9 = smov [#allocation2]  }
  0x17   : > { %s223_s15 = scalar_lea.vmem %s1353_s0, %s787_s12  ;;  %857 = vmatpush3.bf16.msra.mxu0 %v1017_v3  ;;  %897 = vmatpush3.bf16.msra.mxu1 %v1017_v3  ;;  %s216_s12 = sand.u32 1, %s1081_s19  }
  0x18   : > { %v1208_v5 = vld [vmem:[%s223_s15] sm:$0xff]  ;;  %v1210_v6 = vld [vmem:[%s223_s15 + $0x8] sm:$0xff]  ;;  %858 = vmatprep.subr.bf16.mxu0 %v1091_v1  ;;  %898 = vmatprep.subr.bf16.mxu1 %v1091_v1  ;;  %s785_s15 = sshll.u32 %s216_s12, 4  ;;  %s1312_s8 = scalar_lea.sflag [#allocation3], %s216_s12 }
  0x19   : > { %v382_v7 = vmul.f32 %v1208_v5, %v1208_v5  ;;  %v383_v8 = vmul.f32 %v1210_v6, %v1210_v6  ;;  %v1225_v10 = vpack.c.bf16 %v1210_v6, %v1208_v5  ;;  %s218_s23 = scalar_lea.vmem [#allocation2], %s785_s15  ;;  %s1031_s10 = sshll.u32 %s1093_s9, 4  ;;  %s1032_s10 = int_to_ptr.vmem [resolvable:$false] %s1031_s10 }
  0x1a   : > { %s719_s25 = sshll.u32 %s218_s23, 4  ;;  %s1033_s11 = scalar_lea.vmem %s1032_s10, 512  ;;  %s1305_s25 = int_to_ptr.vmem [resolvable:$true] %s719_s25 }
  0x1b   : > { %859 = vmatpush3.bf16.msra.mxu0 %v1018_v4  ;;  %899 = vmatpush3.bf16.msra.mxu1 %v1018_v4  ;;  %v1227_v11 = vpack.c.bf16 %v383_v8, %v382_v7  ;;  %v247_v13 = vunpack.c.l.bf16 %v1225_v10  ;;  %v248_v14 = vunpack.c.h.bf16 %v1225_v10  ;;  %s1027_s22 = scalar_lea.vmem %s1305_s25, 256  ;;  %p1034_p0 = scmp.lt.s32.totalorder %s1305_s25, %s1032_s10 }
  0x1c   : > { %860 = vmatprep.subr.bf16.mxu0 %v1091_v1  ;;  %900 = vmatprep.subr.bf16.mxu1 %v1091_v1  ;;  %p1028_p11 = scmp.ne.s32.totalorder %s1305_s25, %s1027_s22  ;;  %p1035_p1 = scmp.lt.s32.totalorder %s1033_s11, %s1027_s22 }
  0x1d   : > { %v385_v15 = vunpack.c.l.bf16 %v1227_v11  ;;  %v386_v16 = vunpack.c.h.bf16 %v1227_v11  ;;  %v249_v18 = vsub.f32 %v1208_v5, %v247_v13  ;;  %v250_v19 = vsub.f32 %v1210_v6, %v248_v14 }
  0x1e   : > { %p1029_p12 = pnand %p1028_p11, %p1164_p5  ;;  %p1036_p2 = por %p1035_p1, %p1034_p0 }
  0x1f   : > { %861 = vmatpush3.bf16.msra.mxu0 %v1019_v9  ;;  %901 = vmatpush3.bf16.msra.mxu1 %v1019_v9  ;;  %v387_v20 = vsub.f32 %v382_v7, %v385_v15  ;;  %v388_v21 = vsub.f32 %v383_v8, %v386_v16  ;;  %v251_v23 = vpack.c.bf16 %v250_v19, %v249_v18 }
  0x20   : > { %862 = vmatprep.subr.bf16.mxu0 %v1091_v1  ;;  %902 = vmatprep.subr.bf16.mxu1 %v1091_v1  ;;  %p1030_p13 = pneg %p1029_p12 }
  0x21   : > { %v389_v24 = vpack.c.bf16 %v388_v21, %v387_v20 }
  0x22   : > { %p1037_p3 = pnand %p1036_p2, %p1030_p13 }
  0x23   : > { %863 = vmatpush3.bf16.msra.mxu0 %v1020_v12  ;;  %903 = vmatpush3.bf16.msra.mxu1 %v1020_v12 }
  0x24   : > { %864 = vmatprep.subr.bf16.mxu0 %v1091_v1  ;;  %904 = vmatprep.subr.bf16.mxu1 %v1091_v1 }
  0x27   : > { %865 = vmatpush3.bf16.msra.mxu0 %v1021_v17  ;;  %905 = vmatpush3.bf16.msra.mxu1 %v1021_v17 }
  0x28   : > { %866 = vmatprep.subr.bf16.mxu0 %v1091_v1  ;;  %906 = vmatprep.subr.bf16.mxu1 %v1091_v1 }
  0x2b   : > { %867 = vmatpush3.bf16.msra.mxu0 %v1022_v22  ;;  %907 = vmatpush3.bf16.msra.mxu1 %v1022_v22 }
  0x2c   : > { %872 = vmatprep.subr.bf16.mxu0 %v1091_v1  ;;  %912 = vmatprep.subr.bf16.mxu1 %v1091_v1 }
  0x2e   : > { %869 = vmatmul.mubr.bf16.vlgmr.msra.gmra.mrb[0].mxu0 %v251_v23  ;;  %909 = vmatmul.mubr.bf16.vlgmr.msra.gmra.mrb[0].mxu1 %v389_v24 }
  0x2f   : > { %873 = vmatpush3.bf16.msra.mxu0 %v1177_v0  ;;  %913 = vmatpush3.bf16.msra.mxu1 %v1177_v0 }
  0x30   : > { %874 = vmatprep.subr.bf16.mxu0 %v1091_v1  ;;  %914 = vmatprep.subr.bf16.mxu1 %v1091_v1 }
  0x31   : > { %888 = vmatprep.mubr.msk.bf16.mxu0 %vm1092_vm0, %v1091_v1  ;;  %928 = vmatprep.mubr.msk.bf16.mxu1 %vm1092_vm0, %v1091_v1 }
  0x33   : > { %875 = vmatpush3.bf16.msra.mxu0 %v1186_v2  ;;  %915 = vmatpush3.bf16.msra.mxu1 %v1186_v2  ;;  %v800_v2 = vld [vmem:[%s1354_s1] ss:$0 sm:$0xff] }
  0x34   : > { %876 = vmatprep.subr.bf16.mxu0 %v1091_v1  ;;  %916 = vmatprep.subr.bf16.mxu1 %v1091_v1 }
  0x37   : > { %877 = vmatpush3.bf16.msra.mxu0 %v1017_v3  ;;  %917 = vmatpush3.bf16.msra.mxu1 %v1017_v3 }
  0x38   : > { %878 = vmatprep.subr.bf16.mxu0 %v1091_v1  ;;  %918 = vmatprep.subr.bf16.mxu1 %v1091_v1 }
  0x3b   : > { %879 = vmatpush3.bf16.msra.mxu0 %v1018_v4  ;;  %919 = vmatpush3.bf16.msra.mxu1 %v1018_v4 }
  0x3c   : > { %880 = vmatprep.subr.bf16.mxu0 %v1091_v1  ;;  %920 = vmatprep.subr.bf16.mxu1 %v1091_v1 }
  0x3f   : > { %881 = vmatpush3.bf16.msra.mxu0 %v1019_v9  ;;  %921 = vmatpush3.bf16.msra.mxu1 %v1019_v9 }
  0x40   : > { %882 = vmatprep.subr.bf16.mxu0 %v1091_v1  ;;  %922 = vmatprep.subr.bf16.mxu1 %v1091_v1 }
  0x43   : > { %883 = vmatpush3.bf16.msra.mxu0 %v1020_v12  ;;  %923 = vmatpush3.bf16.msra.mxu1 %v1020_v12 }
  0x44   : > { %884 = vmatprep.subr.bf16.mxu0 %v1091_v1  ;;  %924 = vmatprep.subr.bf16.mxu1 %v1091_v1 }
  0x47   : > { %885 = vmatpush3.bf16.msra.mxu0 %v1021_v17  ;;  %925 = vmatpush3.bf16.msra.mxu1 %v1021_v17 }
  0x48   : > { %886 = vmatprep.subr.bf16.mxu0 %v1091_v1  ;;  %926 = vmatprep.subr.bf16.mxu1 %v1091_v1 }
  0x4b   : > { %887 = vmatpush3.bf16.msra.mxu0 %v1022_v22  ;;  %927 = vmatpush3.bf16.msra.mxu1 %v1022_v22 }
  0x4c   : > { %932 = vmatprep.subr.bf16.mxu0 %v1091_v1  ;;  %944 = vmatprep.subr.bf16.mxu1 %v1091_v1 }
  0x4e   : > { %889 = vmatmul.mubr.bf16.vlgmr.msra.gmra.mrb[0].mxu0 %v1225_v10  ;;  %929 = vmatmul.mubr.bf16.vlgmr.msra.gmra.mrb[0].mxu1 %v1227_v11 }
  0x4f   : > { %934 = vmatprep.mubr.msk.bf16.mxu0 %vm1092_vm0, %v1091_v1  ;;  %946 = vmatprep.mubr.msk.bf16.mxu1 %vm1092_vm0, %v1091_v1 }
  0x50   : > { %933 = vmatpush3.bf16.msra.mxu0 %v498_v26  ;;  %945 = vmatpush3.bf16.msra.mxu1 %v498_v26 }
  0x51   : > { %938 = vmatprep.subr.bf16.mxu0 %v1091_v1  ;;  %950 = vmatprep.subr.bf16.mxu1 %v1091_v1 }
 0x121   : > { %v375_v27 = vpop.f32.mrb[0].mxu0  ;;  %v465_v28 = vpop.f32.mrb[0].mxu1 }
 0x122   : > { %v472_v29 = vmul.f32 0.03125, %v375_v27  ;;  %v890_v30 = vpop.f32.mrb[1].mxu0  ;;  %v930_v31 = vpop.f32.mrb[1].mxu1  ;;  %v474_v34 = vmul.f32 0.03125, %v465_v28 }
 0x123   : > { %v378_v32 = vpop.f32.mrb[2].mxu0  ;;  %v468_v33 = vpop.f32.mrb[2].mxu1 }
 0x124   : > { %v476_v35 = vmul.f32 %v472_v29, %v472_v29  ;;  %v473_v36 = vmul.f32 0.03125, %v378_v32  ;;  %v891_v37 = vpop.f32.mrb[3].mxu0  ;;  %v931_v38 = vpop.f32.mrb[3].mxu1  ;;  %v475_v41 = vmul.f32 0.03125, %v468_v33 }
 0x126   : > { %v478_v39 = vsub.f32 %v474_v34, %v476_v35  ;;  %v486_v40 = vpack.c.bf16 %v473_v36, %v472_v29  ;;  %v477_v42 = vmul.f32 %v473_v36, %v473_v36 }
 0x128   : > { %v480_v43 = vmax.f32 %v478_v39, 0.0  ;;  %v487_v44 = vunpack.c.l.bf16 %v486_v40  ;;  %v488_v45 = vunpack.c.h.bf16 %v486_v40  ;;  %v479_v46 = vsub.f32 %v475_v41, %v477_v42 }
 0x12a   : > { %v482_v47 = vadd.f32 1e-06, %v480_v43  ;;  %v489_v48 = vsub.f32 %v472_v29, %v487_v44  ;;  %v490_v49 = vsub.f32 %v473_v36, %v488_v45  ;;  %v481_v50 = vmax.f32 %v479_v46, 0.0 }
 0x12c   : > { %v491_v51 = vpack.c.bf16 %v490_v49, %v489_v48  ;;  %v483_v52 = vadd.f32 1e-06, %v481_v50  ;;  %1023 = vrsqrt.f32 %v482_v47 }
 0x12e   : > { %1025 = vrsqrt.f32 %v483_v52  ;;  %935 = vmatmul.mubr.msk.bf16.vlgmr.msra.gmra.mrb[4].mxu0 %vm492_vm2, %v491_v51 }
 0x12f   : > { %939 = vmatpush3.bf16.msra.mxu0 %v498_v26  ;;  %940 = vmatprep.mubr.msk.bf16.mxu0 %vm1092_vm0, %v1091_v1 }
 0x136   : > { %v1024_v53 = vpop.eup %1023 }
 0x138   : > { %v1026_v54 = vpop.eup %1025 }
 0x139   : > { %v585_v55 = vpack.c.bf16 %v1026_v54, %v1024_v53 }
 0x13a   : > { %941 = vmatmul.mubr.msk.bf16.vlgmr.msra.gmra.mrb[4].mxu0 %vm492_vm2, %v486_v40 }
 0x13b   : > { %v586_v56 = vunpack.c.l.bf16 %v585_v55  ;;  %v587_v57 = vunpack.c.h.bf16 %v585_v55 }
 0x13d   : > { %v588_v58 = vsub.f32 %v1024_v53, %v586_v56  ;;  %v589_v59 = vsub.f32 %v1026_v54, %v587_v57 }
 0x13f   : > { %v590_v60 = vpack.c.bf16 %v589_v59, %v588_v58 }
 0x141   : > { %947 = vmatmul.mubr.msk.bf16.vlgmr.msra.gmra.mrb[4].mxu1 %vm492_vm2, %v590_v60 }
 0x142   : > { %951 = vmatpush3.bf16.msra.mxu1 %v498_v26  ;;  %952 = vmatprep.mubr.msk.bf16.mxu1 %vm1092_vm0, %v1091_v1  ;;  %v801_v1 = vld [vmem:[%s1355_s2] ss:$0 sm:$0xff] }
 0x14d   : > { %953 = vmatmul.mubr.msk.bf16.vlgmr.msra.gmra.mrb[4].mxu1 %vm492_vm2, %v585_v55 }
 0x20d   : > { %v578_v61 = vpop.f32.mrb[4].mxu0 }
 0x20e   : > { %v942_v62 = vpop.f32.mrb[5].mxu0 }
 0x20f   : > { %v581_v63 = vpop.f32.mrb[6].mxu0 }
 0x210   : > { %v943_v0 = vpop.f32.mrb[7].mxu0 }
 0x220   : > { %v672_v3 = vpop.f32.mrb[4].mxu1 }
 0x221   : > { %v687_v4 = vmul.f32 %v800_v2, %v672_v3  ;;  %v954_v7 = vpop.f32.mrb[5].mxu1 }
 0x222   : > { %v675_v8 = vpop.f32.mrb[6].mxu1 }
 0x223   : > { %v691_v9 = vmul.f32 %v687_v4, %v578_v61  ;;  %v688_v10 = vmul.f32 %v800_v2, %v675_v8  ;;  %v955_v11 = vpop.f32.mrb[7].mxu1  ;;  %v689_v12 = vmul.f32 %v687_v4, %v1208_v5 }
 0x225   : > { %v699_v13 = vsub.f32 %v801_v1, %v691_v9  ;;  %v692_v14 = vmul.f32 %v688_v10, %v581_v63  ;;  %v690_v16 = vmul.f32 %v688_v10, %v1210_v6 }
 0x227   : > { %v701_v15 = vadd.f32 %v699_v13, %v689_v12  ;;  %v700_v17 = vsub.f32 %v801_v1, %v692_v14 }
 0x229   : > { %703 = vst [vmem:[%s218_s23] sm:$0xff] %v701_v15  ;;  %v702_v5 = vadd.f32 %v700_v17, %v690_v16 }
 0x22b   : > { %704 = vst [vmem:[%s218_s23 + $0x8] sm:$0xff] %v702_v5 }
 0x22c   : > { %1040 = shalt.err (!%p1037_p3)
}
 0x22d   : > { %s1041_s12 = scalar_lea.hbm %s1310_s7, 256  ;;  %s1045_s15 = scalar_lea.hbm %s1358_s5, 512 }
 0x22e   : > { %p1042_p4 = scmp.ne.s32.totalorder %s1310_s7, %s1041_s12  ;;  %p1046_p9 = scmp.lt.u32.totalorder %s1310_s7, %s1358_s5 }
 0x22f   : > { %p1047_p10 = scmp.lt.u32.totalorder %s1045_s15, %s1041_s12  ;;  %p1049_p12 = scmp.lt.u32.totalorder %s1041_s12, %s1310_s7 }
 0x230   : > { %p1043_p7 = pnand %p1042_p4, %p1164_p5 }
 0x231   : > { %p1048_p11 = por %p1047_p10, %p1046_p9 }
 0x232   : > { %p1044_p8 = pneg %p1043_p7 }
 0x233   : > { %p1050_p13 = por %p1049_p12, %p1048_p11 }
 0x235   : > { %p1051_p0 = pnand %p1050_p13, %p1044_p8 }
 0x237   : > { %1054 = shalt.err (!%p1051_p0)
}
 0x238   : > { %s1094_s23 = smov 128   ;;  %s1095_s26 = smov 8  }
 0x239   : > { %972 = dma.vmem_to_hbm [thread:$0]  (%p1164_p5), %s1305_s25, 256, %s1310_s7, %s1312_s8, %s1094_s23, %s1094_s23, %s1095_s26  }
 0x23a PF: > { %p978_p1 = scmp.ge.s32.totalorder %s1089_s21, 2  ;;  %s734_s30 = sand.u32 1, %s1077_s18  }
 0x23b   : > { %s735_s6 = scalar_lea.sflag [#allocation3], %s734_s30 }
 0x23c   : > { %p975_p2 = pnand %p978_p1, %p1168_p6 }
 0x23e   : > { %1072 = dma.done.wait (!%p975_p2), %s735_s6, 256  }
 0x23f   : > { %1074 = vsyncadd (!%p975_p2), %s735_s6, 4294967040  ;;  %p15_p3 = scmp.ge.s32.totalorder %s1151_s24, 4   ;;  %s1361_s18 = smov %s1081_s19 }
 0x240   : > { %s1362_s19 = smov %s1085_s20  ;;  %s1363_s20 = smov %s1162_s27 }
 0x241   : > { %s1364_s21 = smov %s1151_s24  ;;  %17 = sbr.rel (!%p15_p3) target bundleno = 3 (0x3), region = 75 }
 0x248   :  { %740 = vsyncpa [#allocation3], 1 }
 0x249   :  { %742 = vsyncpa [#allocation3 + $0x1], 1 }

</bundles_post_ra>
